<compile_context>
chip_gen: v7x
topology: tpu7x:2x2x1
jax: 0.10.0
libtpu: 0.0.40
codegen_flags: <defaults>
</compile_context>

<pallas_src>
import functools

import jax
import jax.numpy as jnp
from jax.experimental import pallas as pl
from jax.experimental.pallas import tpu as pltpu


def _contrastive_loss_kernel(s_ref, q_ref, o_ref, *, margin, n_rows, tile_n):
    i = pl.program_id(0)

    # Init the SMEM scalar accumulator on the first tile.
    @pl.when(i == 0)
    def _():
        o_ref[0, 0] = jnp.float32(0.0)

    # (TILE_N, D) tile; compute in f32 regardless of input dtype.
    diff = s_ref[...].astype(jnp.float32) - q_ref[...].astype(jnp.float32)
    sq = jnp.sum(diff * diff, axis=-1, keepdims=True)            # (TILE_N, 1)
    d = jnp.sqrt(sq)                                             # (TILE_N, 1)
    loss = 0.5 * (1.0 - d) ** 2 + 0.5 * jnp.maximum(margin - d, 0.0) ** 2

    # Mask padded tail rows of the last tile (loss at d=0 is nonzero, so
    # padding would otherwise corrupt the mean).
    row = jax.lax.broadcasted_iota(jnp.int32, loss.shape, 0) + i * tile_n
    loss = jnp.where(row < n_rows, loss, 0.0)

    # Accumulate this tile's partial sum.
    o_ref[0, 0] += jnp.sum(loss)

    # Finalize: divide by the true batch size on the last tile.
    @pl.when(i == pl.num_programs(0) - 1)
    def _():
        o_ref[0, 0] = o_ref[0, 0] / jnp.float32(n_rows)


def _choose_tile_n(n, d, itemsize, target_tile_bytes=4 * 1024 * 1024):
    """Largest batch tile (multiple of 8) whose input tile is ~<= 4 MiB."""
    rows = (target_tile_bytes // max(1, d * itemsize)) // 8 * 8
    rows = int(max(8, min(rows, 4096)))
    if n <= rows:
        # Block equal to the full batch dim is always layout-legal.
        return n
    return rows


def contrastive_loss(support_embeddings, query_embeddings, margin=1.0, *, tile_n=None):
    """Pallas implementation of ContrastiveLoss.forward. Returns a scalar f32."""
    assert support_embeddings.shape == query_embeddings.shape
    n, d = support_embeddings.shape
    itemsize = jnp.dtype(support_embeddings.dtype).itemsize

    if tile_n is None:
        tile_n = _choose_tile_n(n, d, itemsize)
    tile_n = int(min(tile_n, n))
    grid = pl.cdiv(n, tile_n)

    # 2 inputs x 2 pipeline buffers x tile, plus slack for f32 intermediates.
    tile_bytes = tile_n * d * itemsize
    vmem_limit = int(min(max(8 * tile_bytes + (1 << 20), 16 << 20), 64 << 20))

    kernel = functools.partial(
        _contrastive_loss_kernel,
        margin=float(margin),
        n_rows=int(n),
        tile_n=tile_n,
    )

    cost = pl.CostEstimate(
        flops=3 * n * d + 8 * n,          # diff, square, row-sum + tiny epilogue
        transcendentals=n,                # sqrt per row
        bytes_accessed=2 * n * d * itemsize + 4,
    )

    out = pl.pallas_call(
        kernel,
        out_shape=jax.ShapeDtypeStruct((1, 1), jnp.float32),
        grid_spec=pltpu.PrefetchScalarGridSpec(
            num_scalar_prefetch=0,
            grid=(grid,),
            in_specs=[
                pl.BlockSpec((tile_n, d), lambda i: (i, 0)),
                pl.BlockSpec((tile_n, d), lambda i: (i, 0)),
            ],
            out_specs=pl.BlockSpec(
                (1, 1), lambda i: (0, 0), memory_space=pltpu.MemorySpace.SMEM
            ),
        ),
        compiler_params=pltpu.CompilerParams(
            dimension_semantics=("arbitrary",),   # accumulated output -> reduction axis
            vmem_limit_bytes=vmem_limit,
        ),
        cost_estimate=cost,
    )(support_embeddings, query_embeddings)
    return out[0, 0]


def _reference(support, query, margin=1.0):
    d = jnp.sqrt(jnp.sum((support.astype(jnp.float32) - query.astype(jnp.float32)) ** 2, axis=1))
    loss = 0.5 * (1.0 - d) ** 2 + 0.5 * jnp.maximum(margin - d, 0.0) ** 2
    return jnp.mean(loss)


if __name__ == "__main__":
    key = jax.random.PRNGKey(0)
    k1, k2, k3, k4 = jax.random.split(key, 4)

    # Case 1: small (batch, embedding_dim), single-tile path.
    N, D = 8, 32
    support = jax.random.normal(k1, (N, D), dtype=jnp.float32)
    query = jax.random.normal(k2, (N, D), dtype=jnp.float32)

    out = contrastive_loss(support, query, margin=1.0)
    out = jax.block_until_ready(out)
    ref = _reference(support, query, margin=1.0)
    assert jnp.allclose(out, ref, rtol=1e-5, atol=1e-5), (out, ref)

    # Case 2: multi-tile path with a ragged tail (exercises masking + accumulator).
    N2, D2 = 20, 32
    support2 = jax.random.normal(k3, (N2, D2), dtype=jnp.float32)
    query2 = jax.random.normal(k4, (N2, D2), dtype=jnp.float32)

    out2 = contrastive_loss(support2, query2, margin=1.0, tile_n=8)
    out2 = jax.block_until_ready(out2)
    ref2 = _reference(support2, query2, margin=1.0)
    assert jnp.allclose(out2, ref2, rtol=1e-5, atol=1e-5), (out2, ref2)

    print("KERNEL_OK")
</pallas_src>

<mosaic_0001>
module attributes {stable_mosaic.version = 11 : i64} {
  func.func @_contrastive_loss_kernel(%arg0: i32, %arg1: memref<8x32xf32, #tpu.memory_space<vmem>>, %arg2: memref<8x32xf32, #tpu.memory_space<vmem>>, %arg3: memref<1x1xf32, #tpu.memory_space<smem>>) attributes {dimension_semantics = [#tpu.dimension_semantics<arbitrary>], iteration_bounds = array<i64: 1>, scalar_prefetch = 0 : i64, scratch_operands = 0 : i64, tpu.core_type = #tpu.core_type<tc>, window_params = [{transform_indices = @transform_0, window_bounds = array<i64: 8, 32>}, {transform_indices = @transform_1, window_bounds = array<i64: 8, 32>}, {transform_indices = @transform_2, window_bounds = array<i64: 1, 1>}]} {
    %c0_i32 = arith.constant 0 : i32
    %0 = arith.cmpi eq, %arg0, %c0_i32 : i32
    %1 = arith.extui %0 : i1 to i32
    %c0_i32_0 = arith.constant 0 : i32
    %2 = arith.cmpi ne, %1, %c0_i32_0 : i32
    scf.if %2 {
      %cst_18 = arith.constant 0.000000e+00 : f32
      %c0_19 = arith.constant 0 : index
      %c0_20 = arith.constant 0 : index
      %41 = memref.load %arg3[%c0_19, %c0_20] : memref<1x1xf32, #tpu.memory_space<smem>>
      memref.store %cst_18, %arg3[%c0_19, %c0_20] : memref<1x1xf32, #tpu.memory_space<smem>>
    } else {
    }
    %c0 = arith.constant 0 : index
    %c0_1 = arith.constant 0 : index
    %3 = vector.load %arg1[%c0, %c0_1] : memref<8x32xf32, #tpu.memory_space<vmem>>, vector<8x32xf32>
    %c0_2 = arith.constant 0 : index
    %c0_3 = arith.constant 0 : index
    %4 = vector.load %arg2[%c0_2, %c0_3] : memref<8x32xf32, #tpu.memory_space<vmem>>, vector<8x32xf32>
    %5 = arith.subf %3, %4 : vector<8x32xf32>
    %6 = arith.mulf %5, %5 : vector<8x32xf32>
    %cst = arith.constant dense<0.000000e+00> : vector<8xf32>
    %7 = vector.multi_reduction <add>, %6, %cst [1] : vector<8x32xf32> to vector<8xf32>
    %8 = vector.shape_cast %7 : vector<8xf32> to vector<8x1xf32>
    %9 = math.sqrt %8 : vector<8x1xf32>
    %cst_4 = arith.constant 1.000000e+00 : f32
    %10 = vector.broadcast %cst_4 : f32 to vector<8x1xf32>
    %11 = arith.subf %10, %9 : vector<8x1xf32>
    %12 = arith.mulf %11, %11 : vector<8x1xf32>
    %cst_5 = arith.constant 5.000000e-01 : f32
    %13 = vector.broadcast %cst_5 : f32 to vector<8x1xf32>
    %14 = arith.mulf %13, %12 : vector<8x1xf32>
    %cst_6 = arith.constant 1.000000e+00 : f32
    %15 = vector.broadcast %cst_6 : f32 to vector<8x1xf32>
    %16 = arith.subf %15, %9 : vector<8x1xf32>
    %cst_7 = arith.constant 0.000000e+00 : f32
    %17 = vector.broadcast %cst_7 : f32 to vector<8x1xf32>
    %18 = arith.maximumf %16, %17 : vector<8x1xf32>
    %19 = arith.mulf %18, %18 : vector<8x1xf32>
    %cst_8 = arith.constant 5.000000e-01 : f32
    %20 = vector.broadcast %cst_8 : f32 to vector<8x1xf32>
    %21 = arith.mulf %20, %19 : vector<8x1xf32>
    %22 = arith.addf %14, %21 : vector<8x1xf32>
    %23 = tpu.iota {dimensions = array<i32: 0>} : vector<8x1xi32>
    %c8_i32 = arith.constant 8 : i32
    %24 = arith.muli %arg0, %c8_i32 : i32
    %25 = vector.broadcast %24 : i32 to vector<8x1xi32>
    %26 = arith.addi %23, %25 : vector<8x1xi32>
    %c8_i32_9 = arith.constant 8 : i32
    %27 = vector.broadcast %c8_i32_9 : i32 to vector<8x1xi32>
    %28 = arith.cmpi slt, %26, %27 : vector<8x1xi32>
    %cst_10 = arith.constant 0.000000e+00 : f32
    %29 = vector.broadcast %cst_10 : f32 to vector<8x1xf32>
    %30 = arith.select %28, %22, %29 : vector<8x1xi1>, vector<8x1xf32>
    %c0_11 = arith.constant 0 : index
    %c0_12 = arith.constant 0 : index
    %31 = memref.load %arg3[%c0_11, %c0_12] : memref<1x1xf32, #tpu.memory_space<smem>>
    %32 = vector.shape_cast %30 : vector<8x1xf32> to vector<1x8x1xf32>
    %cst_13 = arith.constant dense<0.000000e+00> : vector<1xf32>
    %33 = vector.multi_reduction <add>, %32, %cst_13 [1, 2] : vector<1x8x1xf32> to vector<1xf32>
    %34 = vector.shape_cast %33 : vector<1xf32> to vector<1x1x1xf32>
    %35 = vector.extract %34[0, 0, 0] : f32 from vector<1x1x1xf32>
    %36 = arith.addf %31, %35 : f32
    %c0_14 = arith.constant 0 : index
    %c0_15 = arith.constant 0 : index
    %37 = memref.load %arg3[%c0_14, %c0_15] : memref<1x1xf32, #tpu.memory_space<smem>>
    memref.store %36, %arg3[%c0_14, %c0_15] : memref<1x1xf32, #tpu.memory_space<smem>>
    %c0_i32_16 = arith.constant 0 : i32
    %38 = arith.cmpi eq, %arg0, %c0_i32_16 : i32
    %39 = arith.extui %38 : i1 to i32
    %c0_i32_17 = arith.constant 0 : i32
    %40 = arith.cmpi ne, %39, %c0_i32_17 : i32
    scf.if %40 {
      %c0_18 = arith.constant 0 : index
      %c0_19 = arith.constant 0 : index
      %41 = memref.load %arg3[%c0_18, %c0_19] : memref<1x1xf32, #tpu.memory_space<smem>>
      %cst_20 = arith.constant 8.000000e+00 : f32
      %42 = arith.divf %41, %cst_20 : f32
      %c0_21 = arith.constant 0 : index
      %c0_22 = arith.constant 0 : index
      %43 = memref.load %arg3[%c0_21, %c0_22] : memref<1x1xf32, #tpu.memory_space<smem>>
      memref.store %42, %arg3[%c0_21, %c0_22] : memref<1x1xf32, #tpu.memory_space<smem>>
    } else {
    }
    return
  }
  func.func @transform_0(%arg0: i32) -> (i32, i32) {
    %c0_i32 = arith.constant 0 : i32
    %c0_i32_0 = arith.constant 0 : i32
    return %arg0, %c0_i32 : i32, i32
  }
  func.func @transform_1(%arg0: i32) -> (i32, i32) {
    %c0_i32 = arith.constant 0 : i32
    %c0_i32_0 = arith.constant 0 : i32
    return %arg0, %c0_i32 : i32, i32
  }
  func.func @transform_2(%arg0: i32) -> (i32, i32) {
    %c0_i32 = arith.constant 0 : i32
    %c0_i32_0 = arith.constant 0 : i32
    %c0_i32_1 = arith.constant 0 : i32
    return %c0_i32, %c0_i32_0 : i32, i32
  }
}

</mosaic_0001>

<bundles_post_ra>
// kernel: tpu_custom_call.1
= control target key start
LH: loop header
LB: loop body
LE: loop exit
PB: predicated region body
PF: predicated region fallthrough
CT: control target
= control target key end

     0   :  { %7 = vsyncpa [#allocation3], 0  ;;  %s231_s0 = inlined_call_operand.hbm [shape: f32[8,32], index: 0, kind: input, shape index: {}]   ;;  %s232_s1 = inlined_call_operand.hbm [shape: f32[8,32], index: 1, kind: input, shape index: {}]   ;;  %s233_s2 = inlined_call_operand.hbm [shape: f32[1,1], index: 2, kind: output, shape index: {}]  }
   0x1   :  { %8 = vsyncpa [#allocation6], 0 }
   0x2   :  { %9 = vsyncpa [#allocation4], 0  ;;  %s177_s9 = smov [#allocation2]   ;;  %s178_s11 = smov [#allocation5]  }
   0x3   :  { %s16_s10 = sshll.u32 %s177_s9, 4  ;;  %s26_s12 = sshll.u32 %s178_s11, 4  ;;  %s17_s10 = int_to_ptr.vmem [resolvable:$true] %s16_s10  ;;  %s27_s12 = int_to_ptr.vmem [resolvable:$true] %s26_s12 }
   0x4   :  { %s117_s15 = scalar_lea.hbm %s231_s0, 128 }
   0x5   :  { %p118_p0 = scmp.ne.s32.totalorder %s231_s0, %s117_s15  ;;  %p121_p1 = scmp.lt.u32.totalorder %s117_s15, %s231_s0 }
   0x7   :  { %p123_p2 = pnand %p121_p1, %p118_p0 }
   0x9   :  { %126 = shalt.err (!%p123_p2)
}
   0xa   :  { %s127_s20 = scalar_lea.vmem %s17_s10, 128  ;;  %p132_p4 = scmp.lt.s32.totalorder %s17_s10, %s17_s10 }
   0xb   :  { %p128_p3 = scmp.ne.s32.totalorder %s17_s10, %s127_s20  ;;  %p133_p5 = scmp.lt.s32.totalorder %s127_s20, %s127_s20 }
   0xd   :  { %p134_p6 = por %p133_p5, %p132_p4 }
   0xf   :  { %p135_p7 = pnand %p134_p6, %p128_p3 }
  0x11   :  { %138 = shalt.err (!%p135_p7)
}
  0x12   :  { %19 = dma.hbm_to_vmem [thread:$0]  %s231_s0, 128, %s17_s10, [#allocation3]  }
  0x13   :  { %s139_s25 = scalar_lea.hbm %s232_s1, 128 }
  0x14   :  { %p140_p8 = scmp.ne.s32.totalorder %s232_s1, %s139_s25  ;;  %p143_p9 = scmp.lt.u32.totalorder %s139_s25, %s232_s1 }
  0x16   :  { %p145_p10 = pnand %p143_p9, %p140_p8 }
  0x18   :  { %148 = shalt.err (!%p145_p10)
}
  0x19   :  { %s149_s30 = scalar_lea.vmem %s27_s12, 128  ;;  %p154_p12 = scmp.lt.s32.totalorder %s27_s12, %s27_s12 }
  0x1a   :  { %p150_p11 = scmp.ne.s32.totalorder %s27_s12, %s149_s30  ;;  %p155_p13 = scmp.lt.s32.totalorder %s149_s30, %s149_s30 }
  0x1c   :  { %p156_p0 = por %p155_p13, %p154_p12 }
  0x1e   :  { %p157_p1 = pnand %p156_p0, %p150_p11 }
  0x20   :  { %160 = shalt.err (!%p157_p1)
}
  0x21   :  { %29 = dma.hbm_to_vmem [thread:$0]  %s232_s1, 128, %s27_s12, [#allocation6]  }
  0x22   :  { %171 = dma.done.wait [#allocation3], 128  }
  0x23   :  { %172 = vsyncadd [#allocation3], 4294967168 }
  0x24   :  { %173 = dma.done.wait [#allocation6], 128  }
  0x25   :  { %174 = vsyncadd [#allocation6], 4294967168  ;;  %v42_v0 = vld [vmem:[#allocation2] sm:$0xff]  ;;  %v43_v1 = vld [vmem:[#allocation5] sm:$0xff]  ;;  %vm46_vm0 = vcmask 261120   ;;  %vm72_vm3 = vcmask 7168  }
  0x26   :  { %v44_v2 = vsub.f32 %v42_v0, %v43_v1  ;;  %s161_s7 = scalar_lea.hbm %s233_s2, 16 }
  0x27   :  { %p162_p2 = scmp.ne.s32.totalorder %s233_s2, %s161_s7  ;;  %p165_p3 = scmp.lt.u32.totalorder %s161_s7, %s233_s2 }
  0x28   :  { %v45_v3 = vmul.f32 %v44_v2, %v44_v2 }
  0x29   :  { %p167_p4 = pnand %p165_p3, %p162_p2 }
  0x2a   :  { %v47_v4 = vsel %vm46_vm0, %v45_v3, 0.0 }
  0x2b   :  { %48 = vadd.xlane.f32.xlu0 %v47_v4 }
  0xb8   :  { %v49_v5 = vpop.xlane.xlu0 %48 }
  0xb9   :  { %115 = vrsqrt.f32 %v49_v5  ;;  %vm52_vm1 = vcmp.eq.f32.partialorder %v49_v5, inf  ;;  %v55_v8 = vand.u32 2147483648, %v49_v5  ;;  %vm54_vm2 = vcmp.eq.f32.partialorder %v49_v5, 0.0 }
  0xc3   :  { %v116_v6 = vpop.eup %115 }
  0xc4   :  { %v51_v7 = vmul.f32 %v116_v6, %v49_v5 }
  0xc6   :  { %v53_v9 = vsel %vm52_vm1, %v49_v5, %v51_v7 }
  0xc7   :  { %v56_v10 = vsel %vm54_vm2, %v55_v8, %v53_v9 }
  0xc8   :  { %v57_v11 = vsub.f32 1.0, %v56_v10 }
  0xca   :  { %v58_v12 = vmul.f32 %v57_v11, %v57_v11  ;;  %v60_v13 = vmax.f32 %v57_v11, 0.0 }
  0xcc   :  { %v61_v14 = vmul.f32 %v60_v13, %v60_v13  ;;  %v59_v15 = vmul.f32 0.5, %v58_v12 }
  0xce   :  { %v62_v16 = vmul.f32 0.5, %v61_v14 }
  0xd0   :  { %v63_v17 = vadd.f32 %v62_v16, %v59_v15 }
  0xd2   :  { %v73_v18 = vsel %vm72_vm3, %v63_v17, 0.0 }
  0xd3   :  { %74 = vadd.xlane.f32.xlu0 %v73_v18 }
 0x160   :  { %v75_v19 = vpop.xlane.xlu0 %74 }
 0x161   :  { %v76_v20 = vrot.slane %v75_v19, 4 }
 0x163   :  { %v77_v21 = vadd.f32 %v76_v20, %v75_v19 }
 0x165   :  { %v78_v22 = vrot.slane %v77_v21, 2 }
 0x167   :  { %v79_v23 = vadd.f32 %v78_v22, %v77_v21 }
 0x169   :  { %v80_v24 = vrot.slane %v79_v23, 1 }
 0x16b   :  { %v81_v25 = vadd.f32 %v80_v24, %v79_v23 }
 0x16d   :  { %109 = vpush %v81_v25 }
 0x19e   :  { %s110_s1 = spop %109 }
 0x19f   :  { %s92_s4 = smul.f32 0.125, %s110_s1 }
 0x1a1   :  { %93 = sst [smem:[#allocation7]] %s92_s4 }
 0x1a2   :  { %170 = shalt.err (!%p167_p4)
}
 0x1a3   :  { %s179_s12 = smov [#allocation7]  }
 0x1a4   :  { %101 = dma.smem_to_hbm %s179_s12, 16, %s233_s2, [#allocation4]  }
 0x1a5   :  { %175 = dma.done.wait [#allocation4], 16  }
 0x1a6   :  { %176 = vsyncadd [#allocation4], 4294967280 }
 0x1a7   :  { %105 = sfence }
 0x1a8   :  { %106 = vsyncpa [#allocation3], 1 }
 0x1a9   :  { %107 = vsyncpa [#allocation6], 1 }
 0x1aa   :  { %108 = vsyncpa [#allocation4], 1 }

</bundles_post_ra>
